<compile_context>
chip_gen: v5e
topology: v5e:2x2
jax: 0.10.0
libtpu: 0.0.40
codegen_flags: <defaults>
</compile_context>

<pallas_src>
import functools

import jax
import jax.numpy as jnp
from jax import lax
from jax.experimental import pallas as pl
from jax.experimental.pallas import tpu as pltpu


def _round_up(x, m):
    return ((x + m - 1) // m) * m


def _pick_tile(dim, preferred):
    """Largest tile <= `preferred` dividing `dim` (dim is a multiple of 128)."""
    t = min(dim, preferred)
    while dim % t != 0:
        t //= 2
    return t


def _pick_batch_tile(batch, per_b_bytes, budget):
    """Batch tile that is either the full batch or a multiple of 8 (sublane rule)."""
    if batch * per_b_bytes <= budget:
        return batch
    cands = [c for c in range(8, batch, 8) if batch % c == 0]
    for c in sorted(cands, reverse=True):
        if c * per_b_bytes <= budget:
            return c
    return cands[0] if cands else batch


def _vmem_limit(total_bytes):
    # 2x margin over the estimated double-buffered working set, floored at a
    # comfortable 16 MiB and capped well inside v7x's 64 MiB physical VMEM.
    return int(min(max(2 * total_bytes, 16 << 20), 48 << 20))


# ---------------------------------------------------------------------------
# Pass 1: fused head projection + learned blend.
#   u[b, n] = sum_f data[b, n, f] * w_blend[f]
# data streamed in compute dtype (bf16 by default); math and output in f32.
# ---------------------------------------------------------------------------
def _project_kernel(data_ref, w_ref, u_ref):
    d = data_ref[...].astype(jnp.float32)            # (TB, TN, F)
    w = w_ref[...].astype(jnp.float32)               # (1, F)
    u_ref[...] = jnp.sum(d * w[None, :, :], axis=-1)  # (TB, TN) f32


# ---------------------------------------------------------------------------
# Pass 2: batched graph aggregation, lane-dense (B, TN) output tiles.
#   out[b, n] = sum_m u[b, m] * adj[n, m]
# adj tiles are consumed in natural (TN, TK) layout; the contraction uses
# dot_general on the last dim of both operands (no in-kernel transpose).
# The f32 output block stays resident across the (last, "arbitrary") k axis
# and is accumulated into directly.
# ---------------------------------------------------------------------------
def _aggregate_resident_kernel(u_ref, adj_ref, out_ref, *, tk):
    # u is fully VMEM-resident as (B, N_pad); slice the k-th chunk in-kernel.
    k = pl.program_id(1)

    @pl.when(k == 0)
    def _():
        out_ref[...] = jnp.zeros_like(out_ref)

    off = pl.multiple_of(k * tk, tk)
    lhs = u_ref[:, pl.ds(off, tk)].astype(adj_ref.dtype)   # (B, TK)
    out_ref[...] += lax.dot_general(
        lhs, adj_ref[...],
        dimension_numbers=(((1,), (1,)), ((), ())),
        preferred_element_type=jnp.float32)


def _aggregate_blocked_kernel(u_ref, adj_ref, out_ref):
    # u streamed as (B, TK) blocks (large-B fallback).
    k = pl.program_id(1)

    @pl.when(k == 0)
    def _():
        out_ref[...] = jnp.zeros_like(out_ref)

    lhs = u_ref[...].astype(adj_ref.dtype)                  # (B, TK)
    out_ref[...] += lax.dot_general(
        lhs, adj_ref[...],
        dimension_numbers=(((1,), (1,)), ((), ())),
        preferred_element_type=jnp.float32)


def stm1_forward(data, adj, w_tm, w_sp, a, *,
                 compute_dtype=jnp.bfloat16, force_u_blocked=False):
    """STM1 forward with synthetic GCN heads. Returns (B, N, 1) float32."""
    B, N, F = data.shape
    isz = jnp.dtype(compute_dtype).itemsize

    # ---- tiny parameter-only algebra, once, in f32 (no bf16 rounding) ----
    a32 = a.astype(jnp.float32)
    yz = a32 / jnp.sum(a32, axis=0, keepdims=True)                  # (2, 1)
    w_blend = (w_tm.astype(jnp.float32) * yz[0, 0]
               + w_sp.astype(jnp.float32) * yz[1, 0])               # (F, 1)
    w_row = w_blend.reshape(1, F)                                   # (1, F) f32

    # ---- pad N to a multiple of 128 (zero rows/cols are exact no-ops) ----
    n_pad = _round_up(N, 128)
    data_c = data.astype(compute_dtype)
    adj_c = adj.astype(compute_dtype)
    if n_pad != N:
        data_c = jnp.pad(data_c, ((0, 0), (0, n_pad - N), (0, 0)))
        adj_c = jnp.pad(adj_c, ((0, n_pad - N), (0, n_pad - N)))

    f_lanes = _round_up(F, 128)   # lane-padded F, for VMEM sizing only

    # ================= pass 1: u = data @ w_blend  -> (B, N_pad) f32 =========
    tn1 = _pick_tile(n_pad, 512)
    per_b = tn1 * f_lanes * isz
    tb = _pick_batch_tile(B, per_b, 4 << 20)

    p1_bytes = (2 * tb * tn1 * f_lanes * isz          # data blocks (dbl-buf)
                + tb * tn1 * f_lanes * 4              # f32 upcast temp
                + 2 * max(tb, 8) * tn1 * 4            # u output blocks
                + f_lanes * 4)                        # weight row
    u = pl.pallas_call(
        _project_kernel,
        out_shape=jax.ShapeDtypeStruct((B, n_pad), jnp.float32),
        grid_spec=pltpu.PrefetchScalarGridSpec(
            num_scalar_prefetch=0,
            grid=(B // tb, n_pad // tn1),
            in_specs=[
                pl.BlockSpec((tb, tn1, F), lambda b, i: (b, i, 0)),
                pl.BlockSpec((1, F), lambda b, i: (0, 0)),
            ],
            out_specs=pl.BlockSpec((tb, tn1), lambda b, i: (b, i)),
        ),
        compiler_params=pltpu.CompilerParams(
            dimension_semantics=("parallel", "parallel"),
            vmem_limit_bytes=_vmem_limit(p1_bytes),
        ),
    )(data_c, w_row)

    # ================= pass 2: out = adj @ u^T  -> (B, N_pad) f32 ============
    tn = _pick_tile(n_pad, 512)                         # output-node tile
    tk = _pick_tile(n_pad, 1024 if isz == 2 else 512)   # contraction tile

    u_bytes_resident = max(B, 8) * n_pad * 4
    u_resident = (not force_u_blocked) and (u_bytes_resident <= (4 << 20))

    adj_bytes = 2 * tn * tk * isz
    out_bytes = 2 * max(B, 8) * tn * 4
    if u_resident:
        kernel2 = functools.partial(_aggregate_resident_kernel, tk=tk)
        u_spec = pl.BlockSpec((B, n_pad), lambda j, k: (0, 0))
        u_bytes = 2 * u_bytes_resident
    else:
        kernel2 = _aggregate_blocked_kernel
        u_spec = pl.BlockSpec((B, tk), lambda j, k: (0, k))
        u_bytes = 2 * max(B, 8) * tk * 4
    p2_bytes = adj_bytes + out_bytes + u_bytes + max(B, 8) * tk * 4

    out2d = pl.pallas_call(
        kernel2,
        out_shape=jax.ShapeDtypeStruct((B, n_pad), jnp.float32),
        grid_spec=pltpu.PrefetchScalarGridSpec(
            num_scalar_prefetch=0,
            grid=(n_pad // tn, n_pad // tk),
            in_specs=[
                u_spec,
                pl.BlockSpec((tn, tk), lambda j, k: (j, k)),
            ],
            out_specs=pl.BlockSpec((B, tn), lambda j, k: (0, j)),
        ),
        compiler_params=pltpu.CompilerParams(
            dimension_semantics=("parallel", "arbitrary"),
            vmem_limit_bytes=_vmem_limit(p2_bytes),
        ),
    )(u, adj_c)

    # Slice padding away; trailing singleton added outside the kernel so the
    # in-kernel stores stay lane-dense.
    return out2d[:, :N][..., None]


def stm1_reference(data, adj, w_tm, w_sp, a):
    # Plain-JAX mirror of the PyTorch forward (with synthetic tm/sp heads),
    # forced to full f32 matmul precision for a meaningful comparison.
    h = jnp.einsum("nm,bmf->bnf", adj, data, precision="highest")
    x1 = jnp.einsum("bnf,fo->bno", h, w_tm, precision="highest")
    x2 = jnp.einsum("bnf,fo->bno", h, w_sp, precision="highest")
    x = jnp.concatenate([x1, x2], axis=-1)                   # [B, N, 2]
    yz = a / jnp.sum(a, axis=0, keepdims=True)               # [2, 1]
    result = jnp.sum(
        jnp.einsum("bnc,co->bno", x, yz, precision="highest"), axis=-1)
    return result[..., None]                                  # [B, N, 1]


if __name__ == "__main__":
    B, N, F = 2, 16, 8

    key = jax.random.PRNGKey(0)
    k_data, k_adj, k_wtm, k_wsp, k_a = jax.random.split(key, 5)

    data = jax.random.normal(k_data, (B, N, F), dtype=jnp.float32)
    adj = jax.random.uniform(k_adj, (N, N), dtype=jnp.float32)

    # Deterministic synthetic parameters (module __init__: a = rand(2,1)).
    # TODO(synk): tm/sp are external sub-modules in the original code; they are
    # modeled here as single-layer GCN heads with weights w_tm / w_sp.
    w_tm = jax.random.normal(k_wtm, (F, 1), dtype=jnp.float32)
    w_sp = jax.random.normal(k_wsp, (F, 1), dtype=jnp.float32)
    a = jax.random.uniform(k_a, (2, 1), dtype=jnp.float32)

    ref = stm1_reference(data, adj, w_tm, w_sp, a)

    # f32 compute path: tight check (also exercises padding N=16 -> 128).
    out = jax.block_until_ready(
        stm1_forward(data, adj, w_tm, w_sp, a, compute_dtype=jnp.float32))
    assert out.shape == (B, N, 1), out.shape
    assert jnp.allclose(out, ref, atol=1e-3, rtol=1e-3), (
        float(jnp.max(jnp.abs(out - ref))))

    # f32 path with the streamed-u (large-B) kernel variant.
    out_blk = jax.block_until_ready(
        stm1_forward(data, adj, w_tm, w_sp, a, compute_dtype=jnp.float32,
                     force_u_blocked=True))
    assert jnp.allclose(out_blk, ref, atol=1e-3, rtol=1e-3), (
        float(jnp.max(jnp.abs(out_blk - ref))))

    # Default bf16 streaming path (f32 accumulation): looser check — bf16
    # operands carry ~0.4% relative rounding.
    out_bf16 = jax.block_until_ready(stm1_forward(data, adj, w_tm, w_sp, a))
    assert out_bf16.shape == (B, N, 1), out_bf16.shape
    assert bool(jnp.all(jnp.isfinite(out_bf16)))
    assert float(jnp.max(jnp.abs(out_bf16 - ref))) < 0.5

    print("KERNEL_OK")
</pallas_src>

<mosaic_0001>
module attributes {stable_mosaic.version = 11 : i64} {
  func.func @_project_kernel(%arg0: i32, %arg1: i32, %arg2: memref<2x128x8xf32, #tpu.memory_space<vmem>>, %arg3: memref<1x8xf32, #tpu.memory_space<vmem>>, %arg4: memref<2x128xf32, #tpu.memory_space<vmem>>) attributes {dimension_semantics = [#tpu.dimension_semantics<parallel>, #tpu.dimension_semantics<parallel>], iteration_bounds = array<i64: 1, 1>, scalar_prefetch = 0 : i64, scratch_operands = 0 : i64, tpu.core_type = #tpu.core_type<tc>, window_params = [{transform_indices = @transform_0, window_bounds = array<i64: 2, 128, 8>}, {pipeline_mode = #tpu.pipeline_mode<synchronous>, transform_indices = @transform_1, window_bounds = array<i64: 1, 8>}, {transform_indices = @transform_2, window_bounds = array<i64: 2, 128>}]} {
    %c0 = arith.constant 0 : index
    %c0_0 = arith.constant 0 : index
    %c0_1 = arith.constant 0 : index
    %0 = vector.load %arg2[%c0, %c0_0, %c0_1] : memref<2x128x8xf32, #tpu.memory_space<vmem>>, vector<2x128x8xf32>
    %c0_2 = arith.constant 0 : index
    %c0_3 = arith.constant 0 : index
    %1 = vector.load %arg3[%c0_2, %c0_3] : memref<1x8xf32, #tpu.memory_space<vmem>>, vector<1x8xf32>
    %2 = vector.shape_cast %1 : vector<1x8xf32> to vector<1x1x8xf32>
    %3 = vector.broadcast %2 : vector<1x1x8xf32> to vector<2x128x8xf32>
    %4 = arith.mulf %0, %3 : vector<2x128x8xf32>
    %cst = arith.constant dense<0.000000e+00> : vector<2x128xf32>
    %5 = vector.multi_reduction <add>, %4, %cst [2] : vector<2x128x8xf32> to vector<2x128xf32>
    %c0_4 = arith.constant 0 : index
    %c0_5 = arith.constant 0 : index
    %6 = vector.load %arg4[%c0_4, %c0_5] : memref<2x128xf32, #tpu.memory_space<vmem>>, vector<2x128xf32>
    tpu.vector_store %arg4[%c0_4, %c0_5], %5 {strides = array<i32>} : memref<2x128xf32, #tpu.memory_space<vmem>>, vector<2x128xf32>,
    return
  }
  func.func @transform_0(%arg0: i32, %arg1: i32) -> (i32, i32, i32) {
    %c0_i32 = arith.constant 0 : i32
    %c0_i32_0 = arith.constant 0 : i32
    return %arg0, %arg1, %c0_i32 : i32, i32, i32
  }
  func.func @transform_1(%arg0: i32, %arg1: i32) -> (i32, i32) {
    %c0_i32 = arith.constant 0 : i32
    %c0_i32_0 = arith.constant 0 : i32
    %c0_i32_1 = arith.constant 0 : i32
    return %c0_i32, %c0_i32_0 : i32, i32
  }
  func.func @transform_2(%arg0: i32, %arg1: i32) -> (i32, i32) {
    %c0_i32 = arith.constant 0 : i32
    return %arg0, %arg1 : i32, i32
  }
}

</mosaic_0001>

<bundles_post_ra>
// kernel: tpu_custom_call.1
= control target key start
LH: loop header
LB: loop body
LE: loop exit
PB: predicated region body
PF: predicated region fallthrough
CT: control target
= control target key end

     0   :  { %vm80_vm0 = vcmask 64512   ;;  %s594_s0 = inlined_call_operand.vmem [shape: f32[2,128,8], index: 0, kind: input, shape index: {}]   ;;  %s595_s1 = inlined_call_operand.vmem [shape: f32[1,8], index: 1, kind: input, shape index: {}]   ;;  %s596_s2 = inlined_call_operand.hbm [shape: f32[2,128], index: 2, kind: output, shape index: {}]  }
   0x1   :  { %v16_v0 = vld [vmem:[%s594_s0 + $0x20] sm:$0xff]  ;;  %v14_v2 = vld [vmem:[%s594_s0 + $0x10] sm:$0xff]  ;;  %v17_v7 = vld [vmem:[%s594_s0 + $0x28] sm:$0xff] }
   0x2   :  { %v373_v1 = vld [vmem:[%s595_s1] ss:$0 sm:$0xff]  ;;  %v15_v8 = vld [vmem:[%s594_s0 + $0x18] sm:$0xff]  ;;  %v13_v12 = vld [vmem:[%s594_s0 + $0x8] sm:$0xff] }
   0x3   :  { %v12_v3 = vld [vmem:[%s594_s0] sm:$0xff]  ;;  %v52_v4 = vmul.f32 %v373_v1, %v16_v0  ;;  %v50_v5 = vmul.f32 %v373_v1, %v14_v2  ;;  %v53_v13 = vmul.f32 %v373_v1, %v17_v7  ;;  %v51_v14 = vmul.f32 %v373_v1, %v15_v8 }
   0x4   :  { %v48_v6 = vmul.f32 %v373_v1, %v12_v3 }
   0x5   :  { %v93_v9 = vsel %vm80_vm0, %v52_v4, 0.0  ;;  %v87_v10 = vsel %vm80_vm0, %v50_v5, 0.0 }
   0x6   :  { %v81_v11 = vsel %vm80_vm0, %v48_v6, 0.0  ;;  %94 = vadd.xlane.f32.xlu2 %v93_v9  ;;  %88 = vadd.xlane.f32.xlu1 %v87_v10 }
   0x7   :  { %82 = vadd.xlane.f32.xlu0 %v81_v11 }
   0x8   :  { %7 = vsyncpa [#allocation3], 0  ;;  %v49_v15 = vmul.f32 %v373_v1, %v13_v12  ;;  %v96_v16 = vsel %vm80_vm0, %v53_v13, 0.0  ;;  %v90_v17 = vsel %vm80_vm0, %v51_v14, 0.0  ;;  %v20_v19 = vld [vmem:[%s594_s0 + $0x40] sm:$0xff]  ;;  %v19_v20 = vld [vmem:[%s594_s0 + $0x38] sm:$0xff] }
   0x9   :  { %v18_v21 = vld [vmem:[%s594_s0 + $0x30] sm:$0xff]  ;;  %v56_v22 = vmul.f32 %v373_v1, %v20_v19  ;;  %v55_v23 = vmul.f32 %v373_v1, %v19_v20  ;;  %v23_v28 = vld [vmem:[%s594_s0 + $0x58] sm:$0xff]  ;;  %v21_v30 = vld [vmem:[%s594_s0 + $0x48] sm:$0xff]  ;;  %vm214_vm1 = vcmask 130112   ;;  %vm218_vm2 = vcmask 195712   ;;  %s314_s19 = sshll.u32 %s596_s2, 4  ;;  %s315_s19 = int_to_ptr.hbm [resolvable:$true] %s314_s19 }
   0xa   :  { %v84_v18 = vsel %vm80_vm0, %v49_v15, 0.0  ;;  %v54_v24 = vmul.f32 %v373_v1, %v18_v21  ;;  %v22_v29 = vld [vmem:[%s594_s0 + $0x50] sm:$0xff]  ;;  %v59_v31 = vmul.f32 %v373_v1, %v23_v28  ;;  %v57_v33 = vmul.f32 %v373_v1, %v21_v30  ;;  %v29_v37 = vld [vmem:[%s594_s0 + $0x88] sm:$0xff]  ;;  %v28_v38 = vld [vmem:[%s594_s0 + $0x80] sm:$0xff] }
   0xb   :  { %v105_v25 = vsel %vm80_vm0, %v56_v22, 0.0  ;;  %v102_v26 = vsel %vm80_vm0, %v55_v23, 0.0  ;;  %v58_v32 = vmul.f32 %v373_v1, %v22_v29  ;;  %v24_v39 = vld [vmem:[%s594_s0 + $0x60] sm:$0xff]  ;;  %v65_v40 = vmul.f32 %v373_v1, %v29_v37  ;;  %v25_v42 = vld [vmem:[%s594_s0 + $0x68] sm:$0xff]  ;;  %v39_v49 = vld [vmem:[%s594_s0 + $0xd8] sm:$0xff] }
   0xc   :  { %v99_v27 = vsel %vm80_vm0, %v54_v24, 0.0  ;;  %v114_v34 = vsel %vm80_vm0, %v59_v31, 0.0  ;;  %v108_v36 = vsel %vm80_vm0, %v57_v33, 0.0  ;;  %v64_v41 = vmul.f32 %v373_v1, %v28_v38  ;;  %v40_v48 = vld [vmem:[%s594_s0 + $0xe0] sm:$0xff]  ;;  %v31_v52 = vld [vmem:[%s594_s0 + $0x98] sm:$0xff]  ;;  %v30_v55 = vld [vmem:[%s594_s0 + $0x90] sm:$0xff] }
   0xd   :  { %v111_v35 = vsel %vm80_vm0, %v58_v32, 0.0  ;;  %v60_v43 = vmul.f32 %v373_v1, %v24_v39  ;;  %v61_v44 = vmul.f32 %v373_v1, %v25_v42  ;;  %v132_v46 = vsel %vm80_vm0, %v65_v40, 0.0  ;;  %v32_v51 = vld [vmem:[%s594_s0 + $0xa0] sm:$0xff]  ;;  %v26_v60 = vld [vmem:[%s594_s0 + $0x70] sm:$0xff]  ;;  %v41_v3 = vld [vmem:[%s594_s0 + $0xe8] sm:$0xff] }
   0xe   :  { %97 = vadd.xlane.f32.xlu2 %v96_v16  ;;  %91 = vadd.xlane.f32.xlu1 %v90_v17  ;;  %v129_v47 = vsel %vm80_vm0, %v64_v41, 0.0  ;;  %v76_v53 = vmul.f32 %v373_v1, %v40_v48  ;;  %v75_v54 = vmul.f32 %v373_v1, %v39_v49  ;;  %v68_v58 = vmul.f32 %v373_v1, %v32_v51  ;;  %v35_v5 = vld [vmem:[%s594_s0 + $0xb8] sm:$0xff]  ;;  %v34_v6 = vld [vmem:[%s594_s0 + $0xb0] sm:$0xff]  ;;  %v33_v9 = vld [vmem:[%s594_s0 + $0xa8] sm:$0xff] }
   0xf   :  { %85 = vadd.xlane.f32.xlu0 %v84_v18  ;;  %v449_v45 = vsel %vm80_vm0, %v61_v44, 0.0  ;;  %v117_v50 = vsel %vm80_vm0, %v60_v43, 0.0  ;;  %v67_v59 = vmul.f32 %v373_v1, %v31_v52  ;;  %v66_v61 = vmul.f32 %v373_v1, %v30_v55  ;;  %v42_v8 = vld [vmem:[%s594_s0 + $0xf0] sm:$0xff]  ;;  %v43_v15 = vld [vmem:[%s594_s0 + $0xf8] sm:$0xff]  ;;  %v37_v24 = vld [vmem:[%s594_s0 + $0xc8] sm:$0xff] }
  0x10   :  { %v165_v56 = vsel %vm80_vm0, %v76_v53, 0.0  ;;  %v162_v57 = vsel %vm80_vm0, %v75_v54, 0.0  ;;  %v62_v62 = vmul.f32 %v373_v1, %v26_v60  ;;  %v141_v0 = vsel %vm80_vm0, %v68_v58, 0.0  ;;  %v27_v21 = vld [vmem:[%s594_s0 + $0x78] sm:$0xff]  ;;  %v38_v23 = vld [vmem:[%s594_s0 + $0xd0] sm:$0xff] }
  0x11   :  { %v138_v2 = vsel %vm80_vm0, %v67_v59, 0.0  ;;  %v135_v4 = vsel %vm80_vm0, %v66_v61, 0.0  ;;  %v77_v7 = vmul.f32 %v373_v1, %v41_v3  ;;  %v78_v10 = vmul.f32 %v373_v1, %v42_v8 }
  0x12   :  { %v123_v63 = vsel %vm80_vm0, %v62_v62, 0.0  ;;  %v71_v12 = vmul.f32 %v373_v1, %v35_v5  ;;  %v70_v13 = vmul.f32 %v373_v1, %v34_v6  ;;  %v69_v16 = vmul.f32 %v373_v1, %v33_v9 }
  0x13   :  { %v168_v11 = vsel %vm80_vm0, %v77_v7, 0.0  ;;  %v171_v14 = vsel %vm80_vm0, %v78_v10, 0.0  ;;  %v79_v17 = vmul.f32 %v373_v1, %v43_v15  ;;  %v74_v28 = vmul.f32 %v373_v1, %v38_v23 }
  0x14   :  { %v150_v19 = vsel %vm80_vm0, %v71_v12, 0.0  ;;  %v147_v20 = vsel %vm80_vm0, %v70_v13, 0.0  ;;  %v144_v22 = vsel %vm80_vm0, %v69_v16, 0.0  ;;  %v73_v29 = vmul.f32 %v373_v1, %v37_v24 }
  0x15   :  { %v174_v18 = vsel %vm80_vm0, %v79_v17, 0.0  ;;  %v159_v31 = vsel %vm80_vm0, %v74_v28, 0.0  ;;  %vm222_vm3 = vcmask 261312   ;;  %vm226_vm4 = vcmask 326912  }
  0x16   :  { %106 = vadd.xlane.f32.xlu2 %v105_v25  ;;  %103 = vadd.xlane.f32.xlu1 %v102_v26  ;;  %v63_v25 = vmul.f32 %v373_v1, %v27_v21  ;;  %v36_v26 = vld [vmem:[%s594_s0 + $0xc0] sm:$0xff]  ;;  %v156_v32 = vsel %vm80_vm0, %v73_v29, 0.0  ;;  %vm230_vm5 = vcmask 392512   ;;  %vm234_vm6 = vcmask 458112   ;;  %s351_s0 = smov [#allocation2]  }
  0x17   :  { %100 = vadd.xlane.f32.xlu0 %v99_v27  ;;  %v72_v30 = vmul.f32 %v373_v1, %v36_v26  ;;  %vm238_vm7 = vcmask 523712   ;;  %vm242_vm8 = vcmask 589312   ;;  %vm246_vm9 = vcmask 654912   ;;  %s312_s17 = sshll.u32 %s351_s0, 4  ;;  %s313_s17 = int_to_ptr.vmem [resolvable:$true] %s312_s17 }
  0x18   :  { %v126_v27 = vsel %vm80_vm0, %v63_v25, 0.0  ;;  %vm250_vm10 = vcmask 720512   ;;  %vm254_vm11 = vcmask 786112   ;;  %vm258_vm12 = vcmask 851712  }
  0x19   :  { %v153_v33 = vsel %vm80_vm0, %v72_v30, 0.0  ;;  %vm262_vm13 = vcmask 917312   ;;  %vm266_vm14 = vcmask 982912   ;;  %vm270_vm15 = vcmask 1048512  }
  0x1a   :  { %vm303_vm0 = vcmask 1041409  }
  0x1e   :  { %115 = vadd.xlane.f32.xlu2 %v114_v34  ;;  %112 = vadd.xlane.f32.xlu1 %v111_v35  ;;  %v209_v34 = vlaneseq }
  0x1f   :  { %109 = vadd.xlane.f32.xlu0 %v108_v36 }
  0x20   :  { %v535_v37 = vand.u32 127, %v209_v34 }
  0x22   :  { %v212_v38 = vadd.s32 4294967288, %v535_v37  ;;  %v216_v39 = vadd.s32 4294967280, %v535_v37  ;;  %v220_v3 = vadd.s32 4294967272, %v535_v37  ;;  %v224_v6 = vadd.s32 4294967264, %v535_v37 }
  0x23   :  { %v228_v8 = vadd.s32 4294967256, %v535_v37  ;;  %v232_v16 = vadd.s32 4294967248, %v535_v37  ;;  %v236_v21 = vadd.s32 4294967240, %v535_v37  ;;  %v240_v24 = vadd.s32 4294967232, %v535_v37 }
  0x26   :  { %133 = vadd.xlane.f32.xlu2 %v132_v46  ;;  %130 = vadd.xlane.f32.xlu1 %v129_v47 }
  0x27   :  { %118 = vadd.xlane.f32.xlu0 %v117_v50 }
  0x2e   :  { %142 = vadd.xlane.f32.xlu2 %v141_v0  ;;  %139 = vadd.xlane.f32.xlu1 %v138_v2 }
  0x2f   :  { %136 = vadd.xlane.f32.xlu0 %v135_v4 }
  0x36   :  { %151 = vadd.xlane.f32.xlu2 %v150_v19  ;;  %148 = vadd.xlane.f32.xlu1 %v147_v20 }
  0x37   :  { %145 = vadd.xlane.f32.xlu0 %v144_v22 }
  0x3e   :  { %160 = vadd.xlane.f32.xlu2 %v159_v31  ;;  %157 = vadd.xlane.f32.xlu1 %v156_v32  ;;  %v244_v31 = vadd.s32 4294967224, %v535_v37 }
  0x3f   :  { %154 = vadd.xlane.f32.xlu0 %v153_v33 }
  0x46   :  { %121 = vadd.xlane.f32.xlu2 %v449_v45  ;;  %166 = vadd.xlane.f32.xlu1 %v165_v56 }
  0x47   :  { %163 = vadd.xlane.f32.xlu0 %v162_v57 }
  0x4e   :  { %124 = vadd.xlane.f32.xlu1 %v123_v63  ;;  %172 = vadd.xlane.f32.xlu2 %v171_v14 }
  0x4f   :  { %169 = vadd.xlane.f32.xlu0 %v168_v11 }
  0x56   :  { %175 = vadd.xlane.f32.xlu1 %v174_v18 }
  0x57   :  { %127 = vadd.xlane.f32.xlu0 %v126_v27 }
  0x79   :  { %v95_v1 = vpop.xlane.xlu2 %94  ;;  %v89_v35 = vpop.xlane.xlu1 %88 }
  0x7a   :  { %v83_v36 = vpop.xlane.xlu0 %82  ;;  %v217_v45 = vperm.slane %v89_v35, %v216_v39  ;;  %v225_v20 = vperm.slane %v95_v1, %v224_v6 }
  0x7b   :  { %v211_v43 = vperm.slane %v83_v36, %v535_v37 }
  0x81   :  { %v539_v40 = vpop.xlane.xlu2 %97  ;;  %v92_v41 = vpop.xlane.xlu1 %91 }
  0x82   :  { %v86_v42 = vpop.xlane.xlu0 %85  ;;  %v221_v15 = vperm.slane %v92_v41, %v220_v3  ;;  %v229_v23 = vperm.slane %v539_v40, %v228_v8 }
  0x83   :  { %v213_v44 = vperm.slane %v86_v42, %v212_v38  ;;  %v252_v42 = vadd.s32 4294967208, %v535_v37 }
  0x85   :  { %v215_v46 = vsel %vm214_vm1, %v213_v44, %v211_v43 }
  0x86   :  { %v219_v47 = vsel %vm218_vm2, %v217_v45, %v215_v46 }
  0x87   :  { %v223_v17 = vsel %vm222_vm3, %v221_v15, %v219_v47 }
  0x88   :  { %v227_v25 = vsel %vm226_vm4, %v225_v20, %v223_v17 }
  0x89   :  { %v544_v48 = vpop.xlane.xlu2 %106  ;;  %v546_v49 = vpop.xlane.xlu1 %103  ;;  %v231_v1 = vsel %vm230_vm5, %v229_v23, %v227_v25 }
  0x8a   :  { %v101_v50 = vpop.xlane.xlu0 %100  ;;  %v237_v34 = vperm.slane %v546_v49, %v236_v21  ;;  %v241_v41 = vperm.slane %v544_v48, %v240_v24  ;;  %v256_v49 = vadd.s32 4294967200, %v535_v37  ;;  %v260_v48 = vadd.s32 4294967192, %v535_v37 }
  0x8b   :  { %v233_v26 = vperm.slane %v101_v50, %v232_v16 }
  0x8d   :  { %v235_v35 = vsel %vm234_vm6, %v233_v26, %v231_v1 }
  0x8e   :  { %v239_v43 = vsel %vm238_vm7, %v237_v34, %v235_v35 }
  0x91   :  { %v548_v51 = vpop.xlane.xlu2 %115  ;;  %v550_v52 = vpop.xlane.xlu1 %112 }
  0x92   :  { %v552_v53 = vpop.xlane.xlu0 %109 }
  0x93   :  { %v245_v44 = vperm.slane %v552_v53, %v244_v31  ;;  %v264_v53 = vadd.s32 4294967184, %v535_v37 }
  0x99   :  { %v134_v54 = vpop.xlane.xlu2 %133  ;;  %v131_v55 = vpop.xlane.xlu1 %130 }
  0x9a   :  { %v554_v56 = vpop.xlane.xlu0 %118  ;;  %v273_v62 = vperm.slane %v134_v54, %v212_v38  ;;  %v272_v63 = vperm.slane %v131_v55, %v535_v37  ;;  %v243_v55 = vsel %vm242_vm8, %v241_v41, %v239_v43 }
  0x9c   :  { %v274_v4 = vsel %vm214_vm1, %v273_v62, %v272_v63 }
  0xa1   :  { %v143_v57 = vpop.xlane.xlu2 %142  ;;  %v140_v58 = vpop.xlane.xlu1 %139 }
  0xa2   :  { %v137_v59 = vpop.xlane.xlu0 %136  ;;  %v277_v5 = vperm.slane %v140_v58, %v220_v3  ;;  %v279_v9 = vperm.slane %v143_v57, %v224_v6  ;;  %v247_v58 = vsel %vm246_vm9, %v245_v44, %v243_v55  ;;  %v268_v3 = vadd.s32 4294967176, %v535_v37 }
  0xa3   :  { %v275_v2 = vperm.slane %v137_v59, %v216_v39  ;;  %v248_v39 = vadd.s32 4294967216, %v535_v37 }
  0xa5   :  { %v276_v7 = vsel %vm218_vm2, %v275_v2, %v274_v4  ;;  %v249_v54 = vperm.slane %v550_v52, %v248_v39  ;;  %v257_v2 = vperm.slane %v554_v56, %v256_v49 }
  0xa6   :  { %v278_v12 = vsel %vm222_vm3, %v277_v5, %v276_v7 }
  0xa7   :  { %v280_v19 = vsel %vm226_vm4, %v279_v9, %v278_v12  ;;  %v251_v52 = vsel %vm250_vm10, %v249_v54, %v247_v58 }
  0xa9   :  { %v152_v60 = vpop.xlane.xlu2 %151  ;;  %v149_v61 = vpop.xlane.xlu1 %148 }
  0xaa   :  { %v146_v0 = vpop.xlane.xlu0 %145  ;;  %v283_v18 = vperm.slane %v149_v61, %v232_v16  ;;  %v285_v27 = vperm.slane %v152_v60, %v236_v21 }
  0xab   :  { %v281_v13 = vperm.slane %v146_v0, %v228_v8  ;;  %v253_v0 = vperm.slane %v548_v51, %v252_v42 }
  0xad   :  { %v282_v22 = vsel %vm230_vm5, %v281_v13, %v280_v19  ;;  %v255_v9 = vsel %vm254_vm11, %v253_v0, %v251_v52 }
  0xae   :  { %v284_v28 = vsel %vm234_vm6, %v283_v18, %v282_v22  ;;  %v259_v51 = vsel %vm258_vm12, %v257_v2, %v255_v9 }
  0xaf   :  { %v286_v38 = vsel %vm238_vm7, %v285_v27, %v284_v28 }
  0xb1   :  { %v161_v10 = vpop.xlane.xlu2 %160  ;;  %v158_v11 = vpop.xlane.xlu1 %157 }
  0xb2   :  { %v155_v14 = vpop.xlane.xlu0 %154  ;;  %v289_v36 = vperm.slane %v158_v11, %v244_v31  ;;  %v291_v45 = vperm.slane %v161_v10, %v248_v39 }
  0xb3   :  { %v287_v29 = vperm.slane %v155_v14, %v240_v24 }
  0xb5   :  { %v288_v40 = vsel %vm242_vm8, %v287_v29, %v286_v38 }
  0xb6   :  { %v290_v46 = vsel %vm246_vm9, %v289_v36, %v288_v40 }
  0xb7   :  { %v292_v60 = vsel %vm250_vm10, %v291_v45, %v290_v46 }
  0xb9   :  { %v167_v30 = vpop.xlane.xlu1 %166  ;;  %v122_v32 = vpop.xlane.xlu2 %121 }
  0xba   :  { %v164_v33 = vpop.xlane.xlu0 %163  ;;  %v295_v59 = vperm.slane %v167_v30, %v256_v49  ;;  %v261_v4 = vperm.slane %v122_v32, %v260_v48 }
  0xbb   :  { %v293_v47 = vperm.slane %v164_v33, %v252_v42 }
  0xbc   :  { %v263_v37 = vsel %vm262_vm13, %v261_v4, %v259_v51 }
  0xbd   :  { %v294_v61 = vsel %vm254_vm11, %v293_v47, %v292_v60 }
  0xbe   :  { %v296_v5 = vsel %vm258_vm12, %v295_v59, %v294_v61 }
  0xc1   :  { %v125_v50 = vpop.xlane.xlu1 %124  ;;  %v173_v63 = vpop.xlane.xlu2 %172 }
  0xc2   :  { %v170_v57 = vpop.xlane.xlu0 %169  ;;  %v299_v6 = vperm.slane %v173_v63, %v264_v53  ;;  %v265_v7 = vperm.slane %v125_v50, %v264_v53 }
  0xc3   :  { %v297_v62 = vperm.slane %v170_v57, %v260_v48 }
  0xc4   :  { %v267_v14 = vsel %vm266_vm14, %v265_v7, %v263_v37 }
  0xc5   :  { %v298_v8 = vsel %vm262_vm13, %v297_v62, %v296_v5 }
  0xc6   :  { %v300_v56 = vsel %vm266_vm14, %v299_v6, %v298_v8 }
  0xc9   :  { %v176_v10 = vpop.xlane.xlu1 %175 }
  0xca   :  { %v301_v11 = vperm.slane %v176_v10, %v268_v3  ;;  %v128_v12 = vpop.xlane.xlu0 %127 }
  0xcb   :  { %v269_v13 = vperm.slane %v128_v12, %v268_v3 }
  0xcc   :  { %v302_v15 = vsel %vm270_vm15, %v301_v11, %v300_v56 }
  0xcd   :  { %v271_v16 = vsel %vm270_vm15, %v269_v13, %v267_v14 }
  0xce   :  { %v304_v17 = vsel %vm303_vm0, %v302_v15, %v271_v16 }
  0xcf   :  { %306 = vst [vmem:[#allocation2] sm:$0x3] %v304_v17 }
  0xd0   :  { %317 = dma.vmem_to_hbm [thread:$0]  %s313_s17, 32, %s315_s19, [#allocation3]  }
  0xd1   :  { %349 = dma.done.wait [#allocation3], 32  }
  0xd2   :  { %350 = vsyncadd [#allocation3], 4294967264 }
  0xd3   :  { %322 = vsyncpa [#allocation3], 1 }

</bundles_post_ra>
